<compile_context>
chip_gen: v5e
topology: v5e:2x2
jax: 0.10.0
libtpu: 0.0.40
codegen_flags: <defaults>
</compile_context>

<pallas_src>
import functools

import jax
import jax.numpy as jnp
from jax.experimental import pallas as pl
from jax.experimental.pallas import tpu as pltpu


def _rmsnorm_kernel(x_ref, w_ref, o_ref, *, eps):
    # f32 math, then downcast the normalized activations to the INPUT dtype
    # before the weight multiply -- exactly the torch module's ordering.
    x = x_ref[...].astype(jnp.float32)                       # (ROW_TILE, H)
    var = jnp.mean(x * x, axis=-1, keepdims=True)            # (ROW_TILE, 1)
    inv = jax.lax.rsqrt(var + eps)                            # EUP rsqrt
    normed = (x * inv).astype(x_ref.dtype)                    # .to(input_dtype)
    w = w_ref[...]                                            # (1, H) weight dtype
    o_ref[...] = (w.astype(o_ref.dtype)
                  * normed.astype(o_ref.dtype)).astype(o_ref.dtype)


# Sublane packing per element size (bytes -> rows per packed vreg sublane group).
_SUBLANE_PACK = {4: 8, 2: 16, 1: 32}


def _vmem_limit_bytes():
    """Generation-aware scoped VMEM limit (~5/8 of physical per-TC VMEM)."""
    try:
        cap = int(pltpu.get_tpu_info().vmem_capacity_bytes)
    except Exception:  # query unavailable -> assume the smallest (v7x) part
        cap = 64 * 1024 * 1024
    limit = (cap * 5) // 8
    return max(16 * 1024 * 1024, min(limit, 96 * 1024 * 1024))


def _pick_row_tile(n_rows, h, x_itemsize, out_itemsize, block_budget_bytes,
                   min_grid_steps):
    """Largest sublane-aligned row tile that (a) fits the VMEM block budget
    including the in-body f32 working set and (b) keeps >= min_grid_steps
    grid steps so the pipeline overlaps and v7x's 2 TCs both get work."""
    pack = _SUBLANE_PACK.get(x_itemsize, 8)
    per_row_stream = h * (x_itemsize + out_itemsize)   # double-buffered DMA blocks
    per_row_work = 8 * h                                # ~two f32 temporaries
    vmem_rows = max(pack, block_budget_bytes // (2 * per_row_stream + per_row_work))
    # Grid-depth floor (pure latency hiding on an HBM-bound kernel).
    step_cap_rows = pl.cdiv(n_rows, min_grid_steps)
    row_tile = min(int(vmem_rows), int(step_cap_rows))
    # No point tiling past the (sublane-rounded) total row count.
    rounded_rows = ((n_rows + pack - 1) // pack) * pack
    row_tile = min(row_tile, rounded_rows)
    # Align down to the sublane pack (never below one pack).
    row_tile = max(pack, (row_tile // pack) * pack)
    return row_tile


def rmsnorm(hidden_states, weight, eps=1e-6, row_tile=None,
            vmem_limit_bytes=None, min_grid_steps=8, input_buffers=None):
    """Pallas RMSNorm over the last axis of `hidden_states`.

    hidden_states: (..., H)   weight: (H,)
    Semantics match torch DebugLlamaRMSNorm, including the downcast of the
    normalized activations to the input dtype before the weight multiply.
    """
    orig_shape = hidden_states.shape
    H = orig_shape[-1]
    x2d = hidden_states.reshape(-1, H)
    R = x2d.shape[0]

    # torch: out = weight * normed.to(input_dtype)  -> dtype promotes.
    out_dtype = jnp.promote_types(hidden_states.dtype, weight.dtype)
    w2d = weight.reshape(1, H)

    if vmem_limit_bytes is None:
        vmem_limit_bytes = _vmem_limit_bytes()

    if row_tile is None:
        # Leave ~half of the scoped limit for compiler scratch / weight block.
        block_budget = vmem_limit_bytes // 2
        row_tile = _pick_row_tile(
            R, H, x2d.dtype.itemsize, jnp.dtype(out_dtype).itemsize,
            block_budget, min_grid_steps)

    grid = (pl.cdiv(R, row_tile),)  # ragged last block handled by Pallas masking

    if input_buffers is None:
        in_x_spec = pl.BlockSpec((row_tile, H), lambda i: (i, 0))
    else:
        # Opt-in deeper input buffering for 128 MiB parts (v5e/v6e).
        in_x_spec = pl.BlockSpec((row_tile, H), lambda i: (i, 0),
                                 pipeline_mode=pl.Buffered(input_buffers))

    out = pl.pallas_call(
        functools.partial(_rmsnorm_kernel, eps=eps),
        out_shape=jax.ShapeDtypeStruct((R, H), out_dtype),
        grid_spec=pltpu.PrefetchScalarGridSpec(
            num_scalar_prefetch=0,
            grid=grid,
            in_specs=[
                in_x_spec,
                # Constant index_map -> block revisit, DMA'd once and reused.
                pl.BlockSpec((1, H), lambda i: (0, 0)),
            ],
            out_specs=pl.BlockSpec((row_tile, H), lambda i: (i, 0)),
        ),
        compiler_params=pltpu.CompilerParams(
            dimension_semantics=("parallel",),
            vmem_limit_bytes=vmem_limit_bytes),
    )(x2d, w2d)

    return out.reshape(orig_shape[:-1] + (H,))


def _ref_rmsnorm(x, weight, eps):
    """Pure-JAX reference mirroring the torch forward (incl. cast ordering)."""
    xf = x.astype(jnp.float32)
    var = jnp.mean(xf * xf, axis=-1, keepdims=True)
    normed = (xf * jax.lax.rsqrt(var + eps)).astype(x.dtype)
    return weight * normed


if __name__ == "__main__":
    key = jax.random.PRNGKey(0)
    eps = 1e-6

    # ---- f32 check at the module's small demo shape ----
    batch, seq, hidden = 2, 8, 32
    x = jax.random.normal(key, (batch, seq, hidden), dtype=jnp.float32)
    weight = jnp.ones((hidden,), dtype=jnp.float32)  # torch.ones(hidden_size)

    out = jax.block_until_ready(rmsnorm(x, weight, eps=eps))
    ref = _ref_rmsnorm(x, weight, eps)
    assert out.shape == x.shape, (out.shape, x.shape)
    assert out.dtype == ref.dtype, (out.dtype, ref.dtype)
    assert jnp.allclose(out, ref, atol=1e-5, rtol=1e-5)

    # ---- bf16 check (lane-dense H) to validate torch cast ordering ----
    k2 = jax.random.PRNGKey(1)
    hidden_b = 256
    xb = jax.random.normal(k2, (batch, seq, hidden_b), dtype=jnp.bfloat16)
    wb = jnp.ones((hidden_b,), dtype=jnp.float32)

    outb = jax.block_until_ready(rmsnorm(xb, wb, eps=eps))
    refb = _ref_rmsnorm(xb, wb, eps)
    assert outb.shape == xb.shape, (outb.shape, xb.shape)
    assert outb.dtype == refb.dtype, (outb.dtype, refb.dtype)
    assert jnp.allclose(outb, refb, atol=1e-2, rtol=1e-2)

    print("KERNEL_OK")
</pallas_src>

<mosaic_0001>
module attributes {stable_mosaic.version = 11 : i64} {
  func.func @_rmsnorm_kernel(%arg0: i32, %arg1: memref<8x32xf32, #tpu.memory_space<vmem>>, %arg2: memref<1x32xf32, #tpu.memory_space<vmem>>, %arg3: memref<8x32xf32, #tpu.memory_space<vmem>>) attributes {dimension_semantics = [#tpu.dimension_semantics<parallel>], iteration_bounds = array<i64: 2>, scalar_prefetch = 0 : i64, scratch_operands = 0 : i64, tpu.core_type = #tpu.core_type<tc>, window_params = [{transform_indices = @transform_0, window_bounds = array<i64: 8, 32>}, {pipeline_mode = #tpu.pipeline_mode<synchronous>, transform_indices = @transform_1, window_bounds = array<i64: 1, 32>}, {transform_indices = @transform_2, window_bounds = array<i64: 8, 32>}]} {
    %c0 = arith.constant 0 : index
    %c0_0 = arith.constant 0 : index
    %0 = vector.load %arg1[%c0, %c0_0] : memref<8x32xf32, #tpu.memory_space<vmem>>, vector<8x32xf32>
    %1 = arith.mulf %0, %0 : vector<8x32xf32>
    %cst = arith.constant dense<0.000000e+00> : vector<8xf32>
    %2 = vector.multi_reduction <add>, %1, %cst [1] : vector<8x32xf32> to vector<8xf32>
    %3 = vector.shape_cast %2 : vector<8xf32> to vector<8x1xf32>
    %cst_1 = arith.constant 3.200000e+01 : f32
    %4 = vector.broadcast %cst_1 : f32 to vector<8x1xf32>
    %5 = arith.divf %3, %4 : vector<8x1xf32>
    %cst_2 = arith.constant 9.99999997E-7 : f32
    %6 = vector.broadcast %cst_2 : f32 to vector<8x1xf32>
    %7 = arith.addf %5, %6 : vector<8x1xf32>
    %8 = math.rsqrt %7 : vector<8x1xf32>
    %9 = vector.broadcast %8 : vector<8x1xf32> to vector<8x32xf32>
    %10 = arith.mulf %0, %9 : vector<8x32xf32>
    %c0_3 = arith.constant 0 : index
    %c0_4 = arith.constant 0 : index
    %11 = vector.load %arg2[%c0_3, %c0_4] : memref<1x32xf32, #tpu.memory_space<vmem>>, vector<1x32xf32>
    %12 = vector.broadcast %11 : vector<1x32xf32> to vector<8x32xf32>
    %13 = arith.mulf %12, %10 : vector<8x32xf32>
    %c0_5 = arith.constant 0 : index
    %c0_6 = arith.constant 0 : index
    %14 = vector.load %arg3[%c0_5, %c0_6] : memref<8x32xf32, #tpu.memory_space<vmem>>, vector<8x32xf32>
    tpu.vector_store %arg3[%c0_5, %c0_6], %13 {strides = array<i32>} : memref<8x32xf32, #tpu.memory_space<vmem>>, vector<8x32xf32>,
    return
  }
  func.func @transform_0(%arg0: i32) -> (i32, i32) {
    %c0_i32 = arith.constant 0 : i32
    %c0_i32_0 = arith.constant 0 : i32
    return %arg0, %c0_i32 : i32, i32
  }
  func.func @transform_1(%arg0: i32) -> (i32, i32) {
    %c0_i32 = arith.constant 0 : i32
    %c0_i32_0 = arith.constant 0 : i32
    %c0_i32_1 = arith.constant 0 : i32
    return %c0_i32, %c0_i32_0 : i32, i32
  }
  func.func @transform_2(%arg0: i32) -> (i32, i32) {
    %c0_i32 = arith.constant 0 : i32
    %c0_i32_0 = arith.constant 0 : i32
    return %arg0, %c0_i32 : i32, i32
  }
}

</mosaic_0001>

<bundles_post_ra>
// kernel: tpu_custom_call.1
= control target key start
LH: loop header
LB: loop body
LE: loop exit
PB: predicated region body
PF: predicated region fallthrough
CT: control target
= control target key end

     0   :  { %7 = vsyncpa [#allocation3], 0  ;;  %s674_s0 = inlined_call_operand.hbm [shape: f32[16,32], index: 0, kind: input, shape index: {}]   ;;  %s675_s1 = inlined_call_operand.hbm [shape: f32[1,32], index: 1, kind: input, shape index: {}]   ;;  %s676_s2 = inlined_call_operand.hbm [shape: f32[16,32], index: 2, kind: output, shape index: {}]  }
   0x1   :  { %9 = vsyncpa [#allocation3 + $0x1], 0 }
   0x2   :  { %10 = vsyncpa [#allocation6], 0 }
   0x3   :  { %11 = vsyncpa [#allocation4], 0 }
   0x4   :  { %13 = vsyncpa [#allocation4 + $0x1], 0  ;;  %s530_s9 = smov 0   ;;  %s532_s10 = smov 0  }
   0x5   :  { %s534_s11 = smov 0   ;;  %s536_s12 = smov 0  }
   0x6 LB: > { %s551_s13 = sadd.s32 4294967295, %s511_s12   ;;  %s304_s14 = sadd.s32 4294967294, %s511_s12   ;;  %s511_s12 = sphi %s536_s12, %s686_s12   ;;  %s507_s11 = sphi %s534_s11, %s685_s11   ;;  %s503_s10 = sphi %s532_s10, %s684_s10   ;;  %s499_s9 = sphi %s530_s9, %s683_s9  }
   0x7   : > { %p39_p0 = scmp.ne.s32.totalorder %s503_s10, %s499_s9  ;;  %p40_p1 = scmp.eq.s32.totalorder %s551_s13, 0 }
   0x8   : > { %p84_p2 = scmp.eq.s32.totalorder %s551_s13, 1  ;;  %p90_p3 = scmp.eq.s32.totalorder %s304_s14, 1 }
   0x9   : > { %p560_p4 = por %p40_p1, %p39_p0  ;;  %p305_p5 = scmp.ge.s32.totalorder %s511_s12, 1 }
   0xa   : > { %p565_p6 = por %p90_p3, %p39_p0  ;;  %p97_p7 = scmp.lt.s32.totalorder %s511_s12, 3 }
   0xb   : > { %s109_s19 = sshll.u32 %s675_s1, 4  ;;  %s513_s21 = smov [#allocation5]   ;;  %s110_s19 = int_to_ptr.hbm [resolvable:$true] %s109_s19 }
   0xc   : > { %p573_p8 = pnand %p305_p5, %p97_p7  ;;  %s111_s22 = sshll.u32 %s513_s21, 4  ;;  %s112_s22 = int_to_ptr.vmem [resolvable:$true] %s111_s22 }
   0xd   : > { %s583_s23 = sadd.s32 1, %s511_s12   ;;  %s26_s24 = sadd.s32 1, %s507_s11 }
   0xe   : > { %p326_p10 = pneg %p573_p8  ;;  %s23_s25 = ssub.s32 %s511_s12, %s583_s23 }
   0xf   : > { %p24_p12 = scmp.eq.s32.totalorder %s23_s25, 0  ;;  %p33_p13 = scmp.ne.s32.totalorder %s507_s11, %s503_s10 }
  0x10   : > { %p327_p11 = pnand %p326_p10, %p40_p1  ;;  %p34_p0 = scmp.eq.s32.totalorder %s511_s12, 0 }
  0x11   : > { %s592_s26 = scalar_select %p24_p12, %s507_s11, %s26_s24  }
  0x12   : > { %329 = dma.hbm_to_vmem [thread:$0]  (!%p327_p11), %s110_s19, 16, %s112_s22, [#allocation6]  }
  0x13   : > { %p596_p3 = por %p84_p2, %p33_p13  ;;  %p339_p5 = scmp.lt.s32.totalorder %s511_s12, 2 }
  0x14   : > { %s122_s28 = sand.u32 1, %s507_s11   ;;  %s309_s29 = sshll.u32 %s511_s12, 3 }
  0x15   : > { %p35_p7 = por %p34_p0, %p33_p13  ;;  %s308_s30 = sshll.u32 %s122_s28, 3 }
  0x16   : > { %s130_s5 = scalar_lea.hbm %s674_s0, %s309_s29  ;;  %s126_s7 = scalar_lea.vmem [#allocation2], %s308_s30 }
  0x17   : > { %s132_s6 = sshll.u32 %s130_s5, 4  ;;  %s134_s8 = sshll.u32 %s126_s7, 4  ;;  %s133_s6 = int_to_ptr.hbm [resolvable:$true] %s132_s6  ;;  %s135_s8 = int_to_ptr.vmem [resolvable:$true] %s134_s8 }
  0x18   : > { %p606_p10 = pnand %p339_p5, %p35_p7  ;;  %s123_s17 = scalar_lea.sflag [#allocation3], %s122_s28 }
  0x19   : > { %s411_s18 = sshra.s32 %s133_s6, 4  ;;  %s418_s24 = scalar_lea.hbm %s674_s0, 16  ;;  %s412_s18 = int_to_ptr.hbm [resolvable:$true] %s411_s18 }
  0x1a   : > { %s413_s19 = scalar_lea.hbm %s412_s18, 8  ;;  %p415_p11 = pneg %p606_p10 }
  0x1b   : > { %p414_p2 = scmp.ne.s32.totalorder %s412_s18, %s413_s19  ;;  %p419_p0 = scmp.lt.s32.totalorder %s412_s18, %s674_s0 }
  0x1c   : > { %p420_p5 = scmp.lt.s32.totalorder %s418_s24, %s413_s19 }
  0x1d   : > { %p416_p12 = pnand %p415_p11, %p414_p2 }
  0x1e   : > { %p421_p7 = por %p420_p5, %p419_p0 }
  0x1f   : > { %p417_p13 = pneg %p416_p12 }
  0x21   : > { %p422_p9 = pnand %p421_p7, %p417_p13 }
  0x23   : > { %425 = shalt.err (!%p422_p9)
}
  0x24   : > { %333 = dma.hbm_to_vmem [thread:$0]  (!%p606_p10), %s133_s6, 128, %s135_s8, %s123_s17  }
  0x25   : > { %143 = sbr.rel (%p573_p8) target bundleno = 194 (0xc2), region = 28  ;;  %s623_s28 = sand.u32 (!%p573_p8), 1, %s503_s10  }
  0x26   : > { %s311_s30 = sshll.u32 (!%p573_p8), %s623_s28, 3  ;;  %s146_s3 = scalar_lea.sflag (!%p573_p8), [#allocation3], %s623_s28 }
  0x27   : > { %s149_s4 = scalar_lea.vmem (!%p573_p8), [#allocation2], %s311_s30 }
  0x2a   : > { %486 = dma.done.wait (%p560_p4), %s146_s3, 128  }
  0x2b   : > { %488 = vsyncadd (%p560_p4), %s146_s3, 4294967168 }
  0x2c   : > { %490 = dma.done.wait (%p40_p1), [#allocation6], 16  }
  0x2d   : > { %492 = vsyncadd (%p40_p1), [#allocation6], 4294967280  ;;  %v176_v0 = vld [vmem:[%s149_s4] sm:$0xff]  ;;  %vm178_vm0 = vcmask 261120   ;;  %v514_v3 = vmov 32.0   ;;  %s315_s15 = sshll.u32 %s551_s13, 3 }
  0x2e   : > { %v177_v1 = vmul.f32 %v176_v0, %v176_v0  ;;  %377 = vrcp.f32 %v514_v3  ;;  %s219_s6 = scalar_lea.hbm %s676_s2, %s315_s15  ;;  %v376_v19 = vld [vmem:[#allocation5] ss:$0 sm:$0xff]  ;;  %s175_s7 = scalar_lea.vmem [#allocation7], %s311_s30 }
  0x2f   : > { %s221_s8 = sshll.u32 %s175_s7, 4  ;;  %s223_s14 = sshll.u32 %s219_s6, 4  ;;  %s222_s8 = int_to_ptr.vmem [resolvable:$true] %s221_s8  ;;  %s224_s14 = int_to_ptr.hbm [resolvable:$true] %s223_s14 }
  0x30   : > { %v179_v2 = vsel %vm178_vm0, %v177_v1, 0.0  ;;  %s209_s13 = scalar_lea.sflag [#allocation4], %s623_s28  ;;  %s455_s17 = sshra.s32 %s224_s14, 4  ;;  %s456_s17 = int_to_ptr.hbm [resolvable:$true] %s455_s17 }
  0x31   : > { %180 = vadd.xlane.f32.xlu0 %v179_v2  ;;  %s457_s18 = scalar_lea.hbm %s456_s17, 8  ;;  %s461_s22 = scalar_lea.hbm %s676_s2, 16 }
  0x32   : > { %p458_p1 = scmp.ne.s32.totalorder %s456_s17, %s457_s18  ;;  %p462_p9 = scmp.lt.s32.totalorder %s456_s17, %s676_s2 }
  0x33   : > { %p463_p10 = scmp.lt.s32.totalorder %s461_s22, %s457_s18 }
  0x34   : > { %v378_v4 = vpop.eup %377  ;;  %p459_p4 = pnand %p458_p1, %p596_p3 }
  0x35   : > { %v183_v5 = vmul.f32 32.0, %v378_v4  ;;  %vm187_vm1 = vweird.f32 %v378_v4  ;;  %p464_p2 = por %p463_p10, %p462_p9 }
  0x36   : > { %p460_p8 = pneg %p459_p4 }
  0x37   : > { %v184_v6 = vsub.f32 1.0, %v183_v5 }
  0x38   : > { %p465_p11 = pnand %p464_p2, %p460_p8 }
  0x39   : > { %v185_v7 = vmul.f32 %v378_v4, %v184_v6 }
  0x3b   : > { %v186_v8 = vadd.f32 %v378_v4, %v185_v7 }
  0x3d   : > { %v188_v9 = vsel %vm187_vm1, %v378_v4, %v186_v8 }
  0xa4   : > { %v181_v10 = vpop.xlane.xlu0 %180 }
  0xa5   : > { %v189_v11 = vmul.f32 %v188_v9, %v181_v10 }
  0xa7   : > { %v190_v12 = vadd.f32 1e-06, %v189_v11 }
  0xa9   : > { %379 = vrsqrt.f32 %v190_v12  ;;  %vm197_vm3 = vweird.f32 %v190_v12 }
  0xaf   : > { %v380_v13 = vpop.eup %379 }
  0xb0   : > { %v192_v14 = vmul.f32 %v380_v13, %v190_v12  ;;  %vm198_vm2 = vweird.f32 %v380_v13 }
  0xb1   : > { %vm199_vm4 = vmor %vm197_vm3, %vm198_vm2 }
  0xb2   : > { %v193_v15 = vmul.f32 %v380_v13, %v192_v14 }
  0xb4   : > { %v194_v16 = vmul.f32 0.5, %v193_v15 }
  0xb6   : > { %v195_v17 = vsub.f32 1.5, %v194_v16 }
  0xb8   : > { %v196_v18 = vmul.f32 %v380_v13, %v195_v17 }
  0xba   : > { %v200_v20 = vsel %vm199_vm4, %v380_v13, %v196_v18 }
  0xbb   : > { %v201_v21 = vmul.f32 %v200_v20, %v176_v0 }
  0xbd   : > { %v206_v22 = vmul.f32 %v376_v19, %v201_v21 }
  0xbf   : > { %207 = vst.msk [vmem:[%s175_s7] sm:$0xff] %vm178_vm0, %v206_v22 }
  0xc0   : > { %468 = shalt.err (!%p465_p11)
}
  0xc1   : > { %324 = dma.vmem_to_hbm [thread:$0]  (%p596_p3), %s222_s8, 128, %s224_s14, %s209_s13  }
  0xc2 PF: > { %s235_s29 = sand.u32 1, %s499_s9   ;;  %p682_p12 = scmp.ge.s32.totalorder %s511_s12, 2 }
  0xc3   : > { %s236_s28 = scalar_lea.sflag [#allocation4], %s235_s29 }
  0xc4   : > { %p335_p13 = pnand %p682_p12, %p565_p6 }
  0xc6   : > { %p336_p0 = pneg %p335_p13 }
  0xc8   : > { %494 = dma.done.wait (%p336_p0), %s236_s28, 128  }
  0xc9   : > { %496 = vsyncadd (%p336_p0), %s236_s28, 4294967168  ;;  %p16_p5 = scmp.ge.s32.totalorder %s583_s23, 4   ;;  %s683_s9 = smov %s503_s10 }
  0xca   : > { %s684_s10 = smov %s507_s11  ;;  %s685_s11 = smov %s592_s26 }
  0xcb   : > { %s686_s12 = smov %s583_s23  ;;  %18 = sbr.rel (!%p16_p5) target bundleno = 6 (0x6), region = 77 }
  0xd0   :  { %242 = vsyncpa [#allocation3], 1 }
  0xd1   :  { %244 = vsyncpa [#allocation3 + $0x1], 1 }
  0xd2   :  { %245 = vsyncpa [#allocation6], 1 }
  0xd3   :  { %246 = vsyncpa [#allocation4], 1 }
  0xd4   :  { %248 = vsyncpa [#allocation4 + $0x1], 1 }

</bundles_post_ra>
